<compile_context>
chip_gen: v7x
topology: tpu7x:2x2x1
jax: 0.10.0
libtpu: 0.0.40
codegen_flags: <defaults>
</compile_context>

<pallas_src>
import functools
import math

import jax
import jax.numpy as jnp
from jax import lax
from jax.experimental import pallas as pl
from jax.experimental.pallas import tpu as pltpu

LANE = 128


def _squared_error(a, b):
    # Difference in the input dtype (uses the bf16 VALU on v6e/v7x for bf16
    # inputs), square + accumulation in f32.
    d = (a - b).astype(jnp.float32)
    return d * d


def _validity(b, TR, SR, S, shape, row_guard, lane_guard):
    """Static-flag-gated validity mask for garbage rows / padded lanes."""
    row = lax.broadcasted_iota(jnp.int32, shape, 2)
    grow = b * TR + row
    valid = None
    if row_guard:
        valid = grow < SR
    if lane_guard:
        lane = lax.broadcasted_iota(jnp.int32, shape, 3)
        lv = (grow * LANE + lane) < S
        valid = lv if valid is None else jnp.logical_and(valid, lv)
    return valid


# ----------------------------- kernels ------------------------------------- #

def _masked_loss_kernel(x_ref, y_ref, m_ref, lsum_ref, msum_ref, *scratch,
                        criterion_fn, TR, NS_PER, SR, S,
                        row_guard, lane_guard, single_step):
    """Per (batch row, core segment): sum(criterion(x,y)*mask) and sum(mask)."""
    p = pl.program_id(1)
    s = pl.program_id(2)
    b = p * NS_PER + s                                     # global spatial block

    m = m_ref[...].astype(jnp.float32)                     # (1, 1, TR, 128)
    per = criterion_fn(x_ref[...], y_ref[...]).astype(jnp.float32)  # (1, C, TR, 128)

    if row_guard or lane_guard:                            # rare fallback path
        valid = _validity(b, TR, SR, S, m.shape, row_guard, lane_guard)
        per = jnp.where(valid, per, 0.0)
        m = jnp.where(valid, m, 0.0)

    # mask broadcast over C and C-reduction happen in-register (VPU only).
    contrib = jnp.sum(per * m, axis=1, keepdims=True)      # (1, 1, TR, 128)

    if single_step:                                        # no accumulator at all
        lsum_ref[...] = jnp.sum(contrib).reshape(1, 1, 1, 1)
        msum_ref[...] = jnp.sum(m).reshape(1, 1, 1, 1)
        return

    acc_ref, macc_ref = scratch

    @pl.when(s == 0)
    def _first():
        acc_ref[...] = contrib
        macc_ref[...] = m

    @pl.when(s != 0)
    def _rest():
        acc_ref[...] += contrib
        macc_ref[...] += m

    @pl.when(s == NS_PER - 1)
    def _finalize():
        lsum_ref[...] = jnp.sum(acc_ref[...]).reshape(1, 1, 1, 1)
        msum_ref[...] = jnp.sum(macc_ref[...]).reshape(1, 1, 1, 1)


def _loss_sum_kernel(x_ref, y_ref, lsum_ref, *scratch,
                     criterion_fn, TR, NS_PER, SR, S,
                     row_guard, lane_guard, single_step):
    """mask=None path: accumulate sum(criterion(x, y)); no mask stream."""
    p = pl.program_id(1)
    s = pl.program_id(2)
    b = p * NS_PER + s

    per = criterion_fn(x_ref[...], y_ref[...]).astype(jnp.float32)  # (1, C, TR, 128)

    if row_guard or lane_guard:
        valid = _validity(b, TR, SR, S, (1, 1, TR, LANE), row_guard, lane_guard)
        per = jnp.where(valid, per, 0.0)

    contrib = jnp.sum(per, axis=1, keepdims=True)          # (1, 1, TR, 128)

    if single_step:
        lsum_ref[...] = jnp.sum(contrib).reshape(1, 1, 1, 1)
        return

    acc_ref, = scratch

    @pl.when(s == 0)
    def _first():
        acc_ref[...] = contrib

    @pl.when(s != 0)
    def _rest():
        acc_ref[...] += contrib

    @pl.when(s == NS_PER - 1)
    def _finalize():
        lsum_ref[...] = jnp.sum(acc_ref[...]).reshape(1, 1, 1, 1)


# ----------------------------- wrapper -------------------------------------- #

def _choose_block_rows(SR, C, x_isz, y_isz, masked, budget_bytes):
    """Largest TR keeping resident VMEM (incl. f32 temporaries) under budget,
    preferring a TR that divides SR exactly (no in-kernel edge guard)."""
    per_row = 2 * C * LANE * (x_isz + y_isz)     # x & y blocks, double-buffered
    per_row += 3 * C * LANE * 4                  # f32 block temporaries (per, upcasts)
    per_row += LANE * 4                          # C-reduced f32 loss accumulator
    if masked:
        per_row += 2 * LANE * 4                  # mask block, double-buffered
        per_row += LANE * 4                      # f32 mask accumulator
    tr = budget_bytes // per_row
    if tr >= SR:
        return SR
    tr = max((tr // 8) * 8, 8)
    for cand in range(tr, 7, -8):                # exact division => no edge guard
        if SR % cand == 0:
            return cand
    return tr                                    # fallback: in-kernel row guard


def _prep_spatial(a, S, pad):
    """(N, c, H, W) -> (N, c, SR, 128); reshape is free when H*W % 128 == 0."""
    n, c = a.shape[0], a.shape[1]
    a = a.reshape(n, c, S)
    if pad:
        a = jnp.pad(a, ((0, 0), (0, 0), (0, pad)))
    return a.reshape(n, c, (S + pad) // LANE, LANE)


def masked_criterion(x, y, mask=None, *, criterion_fn=_squared_error,
                     vmem_budget_bytes=8 * 1024 * 1024):
    """JAX/Pallas equivalent of MaskedCriterion (elementwise criterion)."""
    assert x.ndim == 4 and x.shape == y.shape
    N, C, H, W = x.shape
    S = H * W
    pad = (-S) % LANE                 # nonzero only when H*W isn't 128-aligned
    SR = (S + pad) // LANE

    masked = mask is not None
    TR = _choose_block_rows(SR, C, x.dtype.itemsize, y.dtype.itemsize,
                            masked, vmem_budget_bytes)
    ns = pl.cdiv(SR, TR)
    row_guard = (SR % TR) != 0        # garbage rows possible in the last block

    # Lane padding only needs an in-kernel guard when criterion_fn(0,0) is not
    # finite (e.g. log-based losses); for MSE the zero mask / c00 correction
    # handle it for free.
    lane_guard = False
    c00 = 0.0
    if pad:
        c00 = float(criterion_fn(jnp.float32(0.0), jnp.float32(0.0)))
        lane_guard = not math.isfinite(c00)

    # Spatial core split (P axis "parallel" -> both TensorCores on v7x).
    if ns >= 2 and ns % 2 == 0:
        P, NS_PER = 2, ns // 2
    else:
        P, NS_PER = 1, ns
    single_step = (NS_PER == 1)

    xr = _prep_spatial(x, S, pad)
    yr = _prep_spatial(y, S, pad)

    x_spec = pl.BlockSpec((1, C, TR, LANE), lambda n, p, s: (n, 0, p * NS_PER + s, 0))
    y_spec = pl.BlockSpec((1, C, TR, LANE), lambda n, p, s: (n, 0, p * NS_PER + s, 0))
    out_spec = pl.BlockSpec((1, 1, 1, 1), lambda n, p, s: (n, p, 0, 0))
    out_shape = jax.ShapeDtypeStruct((N, P, 1, 1), jnp.float32)
    cparams = pltpu.CompilerParams(
        dimension_semantics=("parallel", "parallel", "arbitrary"),
        vmem_limit_bytes=32 * 1024 * 1024)

    common = dict(criterion_fn=criterion_fn, TR=TR, NS_PER=NS_PER, SR=SR, S=S,
                  row_guard=row_guard, lane_guard=lane_guard,
                  single_step=single_step)

    if not masked:
        # TODO(synk): channel-reducing criteria (3-D loss outputs in PyTorch)
        # have no fused equivalent here; criterion_fn must stay elementwise.
        scratch = [] if single_step else [pltpu.VMEM((1, 1, TR, LANE), jnp.float32)]
        kernel = functools.partial(_loss_sum_kernel, **common)
        lpart = pl.pallas_call(
            kernel,
            out_shape=out_shape,
            grid_spec=pltpu.PrefetchScalarGridSpec(
                num_scalar_prefetch=0,
                grid=(N, P, NS_PER),
                in_specs=[x_spec, y_spec],
                out_specs=out_spec,
                scratch_shapes=scratch),
            compiler_params=cparams,
        )(xr, yr)
        lsum = jnp.sum(lpart)
        if pad and not lane_guard:    # padded elements each contributed c00
            lsum = lsum - jnp.float32(N * C * pad * c00)
        return lsum / jnp.float32(N * C * S)

    assert mask.shape == (N, 1, H, W), mask.shape
    assert jnp.issubdtype(mask.dtype, jnp.floating)
    # TODO(synk): the PyTorch runtime check `0 <= mask[0,0,0,0] <= 1` is a
    # host-side value assert with no clean in-kernel equivalent; skipped.
    mr = _prep_spatial(mask, S, pad)              # zero padding => zero weight
    m_spec = pl.BlockSpec((1, 1, TR, LANE), lambda n, p, s: (n, 0, p * NS_PER + s, 0))

    scratch = [] if single_step else [pltpu.VMEM((1, 1, TR, LANE), jnp.float32),
                                      pltpu.VMEM((1, 1, TR, LANE), jnp.float32)]
    kernel = functools.partial(_masked_loss_kernel, **common)
    lpart, mpart = pl.pallas_call(
        kernel,
        out_shape=(out_shape, out_shape),
        grid_spec=pltpu.PrefetchScalarGridSpec(
            num_scalar_prefetch=0,
            grid=(N, P, NS_PER),
            in_specs=[x_spec, y_spec, m_spec],
            out_specs=(out_spec, out_spec),
            scratch_shapes=scratch),
        compiler_params=cparams,
    )(xr, yr, mr)

    lsum = jnp.sum(lpart)
    mask_sum = jnp.float32(C) * jnp.sum(mpart)    # expand_as(x).sum() == C*sum(mask)
    return jnp.where(mask_sum > 0, lsum / mask_sum, jnp.float32(0.0))


# ----------------------------- demo / checks -------------------------------- #

if __name__ == "__main__":
    key = jax.random.PRNGKey(0)
    kx, ky, km = jax.random.split(key, 3)

    N, C, H, W = 2, 4, 16, 16
    x = jax.random.normal(kx, (N, C, H, W), dtype=jnp.float32)
    y = jax.random.normal(ky, (N, C, H, W), dtype=jnp.float32)
    mask = jax.random.uniform(km, (N, 1, H, W), dtype=jnp.float32)

    # masked MSE (single-step, no-scratch path)
    loss = jax.block_until_ready(masked_criterion(x, y, mask))
    m_full = jnp.broadcast_to(mask, x.shape)
    ref = jnp.sum((x - y) ** 2 * m_full) / jnp.sum(m_full)
    assert jnp.allclose(loss, ref, rtol=1e-5, atol=1e-6), (loss, ref)

    # mask=None fallback (plain mean, no mask streamed)
    loss_nm = jax.block_until_ready(masked_criterion(x, y, None))
    ref_nm = jnp.mean((x - y) ** 2)
    assert jnp.allclose(loss_nm, ref_nm, rtol=1e-5, atol=1e-6), (loss_nm, ref_nm)

    # bf16 inputs: difference taken in bf16, squared/accumulated in f32
    xb, yb = x.astype(jnp.bfloat16), y.astype(jnp.bfloat16)
    loss_bf = jax.block_until_ready(masked_criterion(xb, yb, mask))
    ref_bf = jnp.sum(((xb - yb).astype(jnp.float32)) ** 2 * m_full) / jnp.sum(m_full)
    assert jnp.allclose(loss_bf, ref_bf, rtol=1e-3, atol=1e-3), (loss_bf, ref_bf)

    # no multiple-of-8 divisor fits the tiny budget -> exercises row-guard fallback
    k1, k2, k3 = jax.random.split(jax.random.PRNGKey(1), 3)
    x2 = jax.random.normal(k1, (N, C, 48, 48), dtype=jnp.float32)
    y2 = jax.random.normal(k2, (N, C, 48, 48), dtype=jnp.float32)
    mask2 = jax.random.uniform(k3, (N, 1, 48, 48), dtype=jnp.float32)
    loss2 = jax.block_until_ready(
        masked_criterion(x2, y2, mask2, vmem_budget_bytes=100_000))
    m2 = jnp.broadcast_to(mask2, x2.shape)
    ref2 = jnp.sum((x2 - y2) ** 2 * m2) / jnp.sum(m2)
    assert jnp.allclose(loss2, ref2, rtol=1e-5, atol=1e-6), (loss2, ref2)

    # exact-division multi-step + 2-way spatial core split (P=2) path
    k7, k8, k9 = jax.random.split(jax.random.PRNGKey(3), 3)
    x4 = jax.random.normal(k7, (N, C, 64, 64), dtype=jnp.float32)
    y4 = jax.random.normal(k8, (N, C, 64, 64), dtype=jnp.float32)
    mask4 = jax.random.uniform(k9, (N, 1, 64, 64), dtype=jnp.float32)
    loss4 = jax.block_until_ready(
        masked_criterion(x4, y4, mask4, vmem_budget_bytes=100_000))
    m4 = jnp.broadcast_to(mask4, x4.shape)
    ref4 = jnp.sum((x4 - y4) ** 2 * m4) / jnp.sum(m4)
    assert jnp.allclose(loss4, ref4, rtol=1e-5, atol=1e-6), (loss4, ref4)

    # H*W not a multiple of 128 -> exercises the (rare) zero-pad path
    k4, k5, k6 = jax.random.split(jax.random.PRNGKey(2), 3)
    x3 = jax.random.normal(k4, (N, C, 18, 18), dtype=jnp.float32)
    y3 = jax.random.normal(k5, (N, C, 18, 18), dtype=jnp.float32)
    mask3 = jax.random.uniform(k6, (N, 1, 18, 18), dtype=jnp.float32)
    loss3 = jax.block_until_ready(masked_criterion(x3, y3, mask3))
    m3 = jnp.broadcast_to(mask3, x3.shape)
    ref3 = jnp.sum((x3 - y3) ** 2 * m3) / jnp.sum(m3)
    assert jnp.allclose(loss3, ref3, rtol=1e-5, atol=1e-6), (loss3, ref3)
    loss3_nm = jax.block_until_ready(masked_criterion(x3, y3, None))
    ref3_nm = jnp.mean((x3 - y3) ** 2)
    assert jnp.allclose(loss3_nm, ref3_nm, rtol=1e-5, atol=1e-6), (loss3_nm, ref3_nm)

    print("KERNEL_OK")
</pallas_src>

<mosaic_0001>
module attributes {stable_mosaic.version = 11 : i64} {
  func.func @_masked_loss_kernel(%arg0: i32, %arg1: i32, %arg2: i32, %arg3: memref<1x4x2x128xf32, #tpu.memory_space<vmem>>, %arg4: memref<1x4x2x128xf32, #tpu.memory_space<vmem>>, %arg5: memref<1x1x2x128xf32, #tpu.memory_space<vmem>>, %arg6: memref<1x1x1x1xf32, #tpu.memory_space<vmem>>, %arg7: memref<1x1x1x1xf32, #tpu.memory_space<vmem>>) attributes {dimension_semantics = [#tpu.dimension_semantics<parallel>, #tpu.dimension_semantics<parallel>, #tpu.dimension_semantics<arbitrary>], iteration_bounds = array<i64: 2, 1, 1>, scalar_prefetch = 0 : i64, scratch_operands = 0 : i64, tpu.core_type = #tpu.core_type<tc>, window_params = [{transform_indices = @transform_0, window_bounds = array<i64: 1, 4, 2, 128>}, {transform_indices = @transform_1, window_bounds = array<i64: 1, 4, 2, 128>}, {transform_indices = @transform_2, window_bounds = array<i64: 1, 1, 2, 128>}, {transform_indices = @transform_3, window_bounds = array<i64: 1, 1, 1, 1>}, {transform_indices = @transform_4, window_bounds = array<i64: 1, 1, 1, 1>}]} {
    %c0 = arith.constant 0 : index
    %c0_0 = arith.constant 0 : index
    %c0_1 = arith.constant 0 : index
    %c0_2 = arith.constant 0 : index
    %0 = vector.load %arg5[%c0, %c0_0, %c0_1, %c0_2] : memref<1x1x2x128xf32, #tpu.memory_space<vmem>>, vector<1x1x2x128xf32>
    %c0_3 = arith.constant 0 : index
    %c0_4 = arith.constant 0 : index
    %c0_5 = arith.constant 0 : index
    %c0_6 = arith.constant 0 : index
    %1 = vector.load %arg3[%c0_3, %c0_4, %c0_5, %c0_6] : memref<1x4x2x128xf32, #tpu.memory_space<vmem>>, vector<1x4x2x128xf32>
    %c0_7 = arith.constant 0 : index
    %c0_8 = arith.constant 0 : index
    %c0_9 = arith.constant 0 : index
    %c0_10 = arith.constant 0 : index
    %2 = vector.load %arg4[%c0_7, %c0_8, %c0_9, %c0_10] : memref<1x4x2x128xf32, #tpu.memory_space<vmem>>, vector<1x4x2x128xf32>
    %3 = arith.subf %1, %2 : vector<1x4x2x128xf32>
    %4 = arith.mulf %3, %3 : vector<1x4x2x128xf32>
    %5 = vector.broadcast %0 : vector<1x1x2x128xf32> to vector<1x4x2x128xf32>
    %6 = arith.mulf %4, %5 : vector<1x4x2x128xf32>
    %cst = arith.constant dense<0.000000e+00> : vector<1x2x128xf32>
    %7 = vector.multi_reduction <add>, %6, %cst [1] : vector<1x4x2x128xf32> to vector<1x2x128xf32>
    %8 = vector.shape_cast %7 : vector<1x2x128xf32> to vector<1x1x2x128xf32>
    %9 = vector.shape_cast %8 : vector<1x1x2x128xf32> to vector<1x1x1x2x128xf32>
    %cst_11 = arith.constant dense<0.000000e+00> : vector<1xf32>
    %10 = vector.multi_reduction <add>, %9, %cst_11 [1, 2, 3, 4] : vector<1x1x1x2x128xf32> to vector<1xf32>
    %11 = vector.shape_cast %10 : vector<1xf32> to vector<1x1x1x1x1xf32>
    %12 = vector.extract %11[0, 0, 0, 0, 0] : f32 from vector<1x1x1x1x1xf32>
    %13 = vector.broadcast %12 : f32 to vector<1x1x1x1xf32>
    %c0_12 = arith.constant 0 : index
    %c0_13 = arith.constant 0 : index
    %c0_14 = arith.constant 0 : index
    %c0_15 = arith.constant 0 : index
    %14 = vector.load %arg6[%c0_12, %c0_13, %c0_14, %c0_15] : memref<1x1x1x1xf32, #tpu.memory_space<vmem>>, vector<1x1x1x1xf32>
    tpu.vector_store %arg6[%c0_12, %c0_13, %c0_14, %c0_15], %13 {strides = array<i32>} : memref<1x1x1x1xf32, #tpu.memory_space<vmem>>, vector<1x1x1x1xf32>,
    %15 = vector.shape_cast %0 : vector<1x1x2x128xf32> to vector<1x1x1x2x128xf32>
    %cst_16 = arith.constant dense<0.000000e+00> : vector<1xf32>
    %16 = vector.multi_reduction <add>, %15, %cst_16 [1, 2, 3, 4] : vector<1x1x1x2x128xf32> to vector<1xf32>
    %17 = vector.shape_cast %16 : vector<1xf32> to vector<1x1x1x1x1xf32>
    %18 = vector.extract %17[0, 0, 0, 0, 0] : f32 from vector<1x1x1x1x1xf32>
    %19 = vector.broadcast %18 : f32 to vector<1x1x1x1xf32>
    %c0_17 = arith.constant 0 : index
    %c0_18 = arith.constant 0 : index
    %c0_19 = arith.constant 0 : index
    %c0_20 = arith.constant 0 : index
    %20 = vector.load %arg7[%c0_17, %c0_18, %c0_19, %c0_20] : memref<1x1x1x1xf32, #tpu.memory_space<vmem>>, vector<1x1x1x1xf32>
    tpu.vector_store %arg7[%c0_17, %c0_18, %c0_19, %c0_20], %19 {strides = array<i32>} : memref<1x1x1x1xf32, #tpu.memory_space<vmem>>, vector<1x1x1x1xf32>,
    return
  }
  func.func @transform_0(%arg0: i32, %arg1: i32, %arg2: i32) -> (i32, i32, i32, i32) {
    %c1_i32 = arith.constant 1 : i32
    %0 = arith.muli %arg1, %c1_i32 : i32
    %1 = arith.addi %0, %arg2 : i32
    %c0_i32 = arith.constant 0 : i32
    %c0_i32_0 = arith.constant 0 : i32
    %c0_i32_1 = arith.constant 0 : i32
    return %arg0, %c0_i32, %1, %c0_i32_0 : i32, i32, i32, i32
  }
  func.func @transform_1(%arg0: i32, %arg1: i32, %arg2: i32) -> (i32, i32, i32, i32) {
    %c1_i32 = arith.constant 1 : i32
    %0 = arith.muli %arg1, %c1_i32 : i32
    %1 = arith.addi %0, %arg2 : i32
    %c0_i32 = arith.constant 0 : i32
    %c0_i32_0 = arith.constant 0 : i32
    %c0_i32_1 = arith.constant 0 : i32
    return %arg0, %c0_i32, %1, %c0_i32_0 : i32, i32, i32, i32
  }
  func.func @transform_2(%arg0: i32, %arg1: i32, %arg2: i32) -> (i32, i32, i32, i32) {
    %c1_i32 = arith.constant 1 : i32
    %0 = arith.muli %arg1, %c1_i32 : i32
    %1 = arith.addi %0, %arg2 : i32
    %c0_i32 = arith.constant 0 : i32
    %c0_i32_0 = arith.constant 0 : i32
    %c0_i32_1 = arith.constant 0 : i32
    return %arg0, %c0_i32, %1, %c0_i32_0 : i32, i32, i32, i32
  }
  func.func @transform_3(%arg0: i32, %arg1: i32, %arg2: i32) -> (i32, i32, i32, i32) {
    %c0_i32 = arith.constant 0 : i32
    %c0_i32_0 = arith.constant 0 : i32
    %c0_i32_1 = arith.constant 0 : i32
    return %arg0, %arg1, %c0_i32, %c0_i32_0 : i32, i32, i32, i32
  }
  func.func @transform_4(%arg0: i32, %arg1: i32, %arg2: i32) -> (i32, i32, i32, i32) {
    %c0_i32 = arith.constant 0 : i32
    %c0_i32_0 = arith.constant 0 : i32
    %c0_i32_1 = arith.constant 0 : i32
    return %arg0, %arg1, %c0_i32, %c0_i32_0 : i32, i32, i32, i32
  }
}

</mosaic_0001>

<bundles_post_ra>
// kernel: tpu_custom_call.1
= control target key start
LH: loop header
LB: loop body
LE: loop exit
PB: predicated region body
PF: predicated region fallthrough
CT: control target
= control target key end

     0   :  { %10 = vsyncpa [#allocation3], 0  ;;  %s984_s0 = inlined_call_operand.hbm [shape: f32[2,4,2,128], index: 0, kind: input, shape index: {}]   ;;  %s985_s1 = inlined_call_operand.hbm [shape: f32[2,4,2,128], index: 1, kind: input, shape index: {}]   ;;  %s986_s2 = inlined_call_operand.vmem [shape: f32[2,1,2,128], index: 2, kind: input, shape index: {}]   ;;  %s987_s3 = inlined_call_operand.vmem [shape: f32[2,1,1,1], index: 3, kind: output, shape index: {0}]   ;;  %s988_s4 = inlined_call_operand.vmem [shape: f32[2,1,1,1], index: 4, kind: output, shape index: {1}]  }
   0x1   :  { %12 = vsyncpa [#allocation3 + $0x1], 0 }
   0x2   :  { %13 = vsyncpa [#allocation5], 0 }
   0x3   :  { %15 = vsyncpa [#allocation5 + $0x1], 0  ;;  %s789_s15 = smov 0   ;;  %s791_s16 = smov 0  }
   0x4   :  { %s793_s17 = smov 0   ;;  %s795_s18 = smov 0  }
   0x5   :  { %s797_s19 = smov 0   ;;  %s799_s20 = smov 0  }
   0x6 LB: > { %s560_s21 = sadd.s32 4294967295, %s758_s20   ;;  %s40_s22 = sadd.s32 1, %s754_s19  ;;  %s758_s20 = sphi %s799_s20, %s21_s20   ;;  %s754_s19 = sphi %s797_s19, %s999_s19   ;;  %s750_s18 = sphi %s795_s18, %s998_s18   ;;  %s746_s17 = sphi %s793_s17, %s997_s17   ;;  %s742_s16 = sphi %s791_s16, %s996_s16   ;;  %s738_s15 = sphi %s789_s15, %s995_s15  }
   0x7   : > { %p42_p0 = scmp.ge.s32.totalorder %s40_s22, 2  ;;  %s51_s23 = sadd.s32 1, %s746_s17 }
   0x8   : > { %p58_p1 = scmp.ne.s32.totalorder %s746_s17, %s742_s16  ;;  %p59_p2 = scmp.eq.s32.totalorder %s758_s20, 0 }
   0x9   : > { %s1001_s22 = smov (%p42_p0, %s40_s22), 0  ;;  %p64_p4 = scmp.ne.s32.totalorder %s742_s16, %s738_s15 }
   0xa   : > { %p825_p3 = por %p59_p2, %p58_p1  ;;  %s46_s25 = ssub.s32 %s754_s19, %s1001_s22 }
   0xb   : > { %p65_p5 = scmp.eq.s32.totalorder %s560_s21, 0  ;;  %p49_p6 = scmp.eq.s32.totalorder %s46_s25, 0 }
   0xc   : > { %p593_p8 = scmp.lt.s32.totalorder %s758_s20, 2  ;;  %s841_s28 = sand.u32 1, %s746_s17  }
   0xd   : > { %p832_p7 = por %p65_p5, %p64_p4  ;;  %s576_s29 = sshll.u32 %s754_s19, 7 }
   0xe   : > { %s838_s27 = scalar_select %p49_p6, %s746_s17, %s51_s23  }
   0xf   : > { %s991_s26 = scalar_select %p832_p7, 1, 0 }
  0x10   : > { %s564_s30 = sshll.u32 %s841_s28, 3  ;;  %s850_s7 = scalar_lea.hbm %s984_s0, %s576_s29 }
  0x11   : > { %s208_s8 = scalar_lea.vmem [#allocation2], %s564_s30  ;;  %p856_p9 = pnand %p593_p8, %p825_p3 }
  0x12   : > { %s217_s9 = sshll.u32 %s208_s8, 4  ;;  %s205_s11 = scalar_lea.sflag [#allocation3], %s841_s28  ;;  %s860_s9 = int_to_ptr.vmem [resolvable:$true] %s217_s9 }
  0x13   : > { %s644_s12 = scalar_lea.hbm %s850_s7, 128  ;;  %p646_p11 = pneg %p856_p9 }
  0x14   : > { %p645_p10 = scmp.ne.s32.totalorder %s850_s7, %s644_s12  ;;  %s649_s15 = scalar_lea.hbm %s984_s0, 256 }
  0x15   : > { %p650_p0 = scmp.lt.u32.totalorder %s850_s7, %s984_s0  ;;  %p651_p1 = scmp.lt.u32.totalorder %s649_s15, %s644_s12 }
  0x16   : > { %p647_p12 = pnand %p646_p11, %p645_p10  ;;  %p653_p3 = scmp.lt.u32.totalorder %s644_s12, %s850_s7 }
  0x17   : > { %p652_p2 = por %p651_p1, %p650_p0 }
  0x18   : > { %p648_p13 = pneg %p647_p12 }
  0x19   : > { %p654_p4 = por %p653_p3, %p652_p2 }
  0x1b   : > { %p655_p5 = pnand %p654_p4, %p648_p13 }
  0x1d   : > { %658 = shalt.err (!%p655_p5)
}
  0x1e   : > { %s659_s24 = scalar_lea.vmem %s860_s9, 128  ;;  %s760_s25 = smov [#allocation2]  }
  0x1f   : > { %p660_p6 = scmp.ne.s32.totalorder %s860_s9, %s659_s24  ;;  %s664_s5 = sshll.u32 %s760_s25, 4  ;;  %s665_s5 = int_to_ptr.vmem [resolvable:$false] %s664_s5 }
  0x20   : > { %s666_s6 = scalar_lea.vmem %s665_s5, 256  ;;  %p667_p12 = scmp.lt.s32.totalorder %s860_s9, %s665_s5 }
  0x21   : > { %p662_p8 = pnand %p660_p6, %p646_p11  ;;  %p668_p0 = scmp.lt.s32.totalorder %s666_s6, %s659_s24 }
  0x23   : > { %p663_p10 = pneg %p662_p8  ;;  %p669_p1 = por %p668_p0, %p667_p12 }
  0x25   : > { %p670_p2 = pnand %p669_p1, %p663_p10 }
  0x27   : > { %673 = shalt.err (!%p670_p2)
}
  0x28   : > { %s761_s8 = smov 32   ;;  %s762_s12 = smov 2  }
  0x29   : > { %589 = dma.hbm_to_vmem [thread:$0]  (!%p856_p9), %s850_s7, 128, %s860_s9, %s205_s11, %s761_s8, %s761_s8, %s762_s12  }
  0x2a   : > { %p570_p13 = scmp.ge.s32.totalorder %s758_s20, 1  ;;  %p260_p3 = scmp.lt.s32.totalorder %s758_s20, 3 }
  0x2b   : > { %s904_s21 = scalar_lea.hbm %s985_s1, %s576_s29  ;;  %s231_s23 = scalar_lea.vmem [#allocation4], %s564_s30 }
  0x2c   : > { %p895_p4 = pnand %p570_p13, %p260_p3  ;;  %s240_s24 = sshll.u32 %s231_s23, 4  ;;  %s908_s24 = int_to_ptr.vmem [resolvable:$true] %s240_s24 }
  0x2d   : > { %s228_s7 = scalar_lea.sflag [#allocation5], %s841_s28  ;;  %s674_s9 = scalar_lea.hbm %s904_s21, 128 }
  0x2e   : > { %p675_p5 = scmp.ne.s32.totalorder %s904_s21, %s674_s9  ;;  %s679_s29 = scalar_lea.hbm %s985_s1, 256 }
  0x2f   : > { %p680_p10 = scmp.lt.u32.totalorder %s904_s21, %s985_s1  ;;  %p681_p12 = scmp.lt.u32.totalorder %s679_s29, %s674_s9 }
  0x30   : > { %p677_p6 = pnand %p675_p5, %p646_p11  ;;  %p683_p1 = scmp.lt.u32.totalorder %s674_s9, %s904_s21 }
  0x31   : > { %p682_p0 = por %p681_p12, %p680_p10 }
  0x32   : > { %p678_p8 = pneg %p677_p6 }
  0x33   : > { %p684_p2 = por %p683_p1, %p682_p0 }
  0x35   : > { %p685_p13 = pnand %p684_p2, %p678_p8 }
  0x37   : > { %688 = shalt.err (!%p685_p13)
}
  0x38   : > { %s689_s30 = scalar_lea.vmem %s908_s24, 128  ;;  %s763_s14 = smov [#allocation4]  }
  0x39   : > { %p690_p3 = scmp.ne.s32.totalorder %s908_s24, %s689_s30  ;;  %s694_s15 = sshll.u32 %s763_s14, 4  ;;  %s695_s15 = int_to_ptr.vmem [resolvable:$false] %s694_s15 }
  0x3a   : > { %s696_s23 = scalar_lea.vmem %s695_s15, 256  ;;  %p697_p7 = scmp.lt.s32.totalorder %s908_s24, %s695_s15 }
  0x3b   : > { %p692_p5 = pnand %p690_p3, %p646_p11  ;;  %p698_p10 = scmp.lt.s32.totalorder %s696_s23, %s689_s30 }
  0x3d   : > { %p693_p6 = pneg %p692_p5  ;;  %p699_p12 = por %p698_p10, %p697_p7 }
  0x3f   : > { %p700_p0 = pnand %p699_p12, %p693_p6 }
  0x41   : > { %703 = shalt.err (!%p700_p0)
}
  0x42   : > { %592 = dma.hbm_to_vmem [thread:$0]  (!%p856_p9), %s904_s21, 128, %s908_s24, %s228_s7, %s761_s8, %s761_s8, %s762_s12  }
  0x43   : > { %264 = sbr.rel (%p895_p4) target bundleno = 304 (0x130), region = 32  ;;  %s266_s9 = sand.u32 (!%p895_p4), 1, %s742_s16  }
  0x44   : > { %s571_s11 = sshll.u32 (!%p895_p4), %s266_s9, 3  ;;  %s267_s25 = scalar_lea.sflag (!%p895_p4), [#allocation3], %s266_s9 }
  0x45   : > { %s270_s29 = scalar_lea.vmem (!%p895_p4), [#allocation2], %s571_s11  ;;  %p994_p7 = scmp.ne.s32.totalorder (!%p895_p4), %s991_s26, 0 }
  0x4a   : > { %729 = dma.done.wait (%p994_p7), %s267_s25, 128  }
  0x4b   : > { %731 = vsyncadd (%p994_p7), %s267_s25, 4294967168  ;;  %s276_s10 = scalar_lea.sflag [#allocation5], %s266_s9  ;;  %s279_s28 = scalar_lea.vmem [#allocation4], %s571_s11 }
  0x4c   : > { %733 = dma.done.wait (%p994_p7), %s276_s10, 128  }
  0x4d   : > { %735 = vsyncadd (%p994_p7), %s276_s10, 4294967168  ;;  %p327_p9 = scmp.lt.s32.totalorder %s750_s18, 1  ;;  %v348_v0 = vld [vmem:[%s270_s29] sm:$0x3]  ;;  %v349_v1 = vld [vmem:[%s270_s29 + $0x2] sm:$0x3] }
  0x4e   : > { %v350_v2 = vld [vmem:[%s270_s29 + $0x4] sm:$0x3]  ;;  %v351_v3 = vld [vmem:[%s270_s29 + $0x6] sm:$0x3]  ;;  %v352_v4 = vld [vmem:[%s279_s28] sm:$0x3] }
  0x4f   : > { %s1003_s18 = smov (!%p327_p9, %s750_s18), 1  ;;  %v353_v5 = vld [vmem:[%s279_s28 + $0x2] sm:$0x3]  ;;  %v354_v6 = vld [vmem:[%s279_s28 + $0x4] sm:$0x3]  ;;  %v356_v8 = vsub.f32 %v348_v0, %v352_v4  ;;  %vm368_vm0 = vcmask 1041408  }
  0x50   : > { %s573_s8 = sshll.u32 %s1003_s18, 1  ;;  %v355_v7 = vld [vmem:[%s279_s28 + $0x6] sm:$0x3]  ;;  %v357_v10 = vsub.f32 %v349_v1, %v353_v5  ;;  %v358_v11 = vsub.f32 %v350_v2, %v354_v6  ;;  %s340_s7 = scalar_lea.vmem %s987_s3, %s1003_s18  ;;  %vm387_vm1 = vcmask 0  }
  0x51   : > { %s333_s21 = scalar_lea.vmem %s986_s2, %s573_s8  ;;  %v359_v12 = vsub.f32 %v351_v3, %v355_v7  ;;  %v360_v13 = vmul.f32 %v356_v8, %v356_v8  ;;  %s346_s14 = scalar_lea.vmem %s988_s4, %s1003_s18 }
  0x52   : > { %v347_v9 = vld [vmem:[%s333_s21] sm:$0x3]  ;;  %v361_v14 = vmul.f32 %v357_v10, %v357_v10  ;;  %v362_v15 = vmul.f32 %v358_v11, %v358_v11 }
  0x53   : > { %v363_v16 = vmul.f32 %v359_v12, %v359_v12  ;;  %v364_v17 = vmul.f32 %v360_v13, %v347_v9  ;;  %v389_v29 = vsel %vm368_vm0, %v347_v9, 0.0 }
  0x54   : > { %v365_v18 = vmul.f32 %v361_v14, %v347_v9  ;;  %v366_v19 = vmul.f32 %v362_v15, %v347_v9 }
  0x55   : > { %v367_v20 = vmul.f32 %v363_v16, %v347_v9  ;;  %v369_v21 = vsel %vm368_vm0, %v364_v17, 0.0 }
  0x56   : > { %v370_v22 = vsel %vm368_vm0, %v365_v18, 0.0  ;;  %v372_v23 = vsel %vm368_vm0, %v366_v19, 0.0 }
  0x57   : > { %v371_v24 = vadd.f32 %v370_v22, %v369_v21  ;;  %v374_v25 = vsel %vm368_vm0, %v367_v20, 0.0 }
  0x59   : > { %v373_v26 = vadd.f32 %v372_v23, %v371_v24 }
  0x5b   : > { %v375_v27 = vadd.f32 %v374_v25, %v373_v26 }
  0x5d   : > { %v376_v28 = vsel %vm368_vm0, %v375_v27, 0.0 }
  0x5e   : > { %377 = vadd.xlane.f32.xlu0 %v376_v28 }
  0x62   : > { %390 = vadd.xlane.f32.xlu0 %v389_v29 }
  0xeb   : > { %v378_v30 = vpop.xlane.xlu0 %377 }
  0xec   : > { %v379_v31 = vrot.slane %v378_v30, 4 }
  0xee   : > { %v380_v32 = vadd.f32 %v379_v31, %v378_v30 }
  0xef   : > { %v391_v33 = vpop.xlane.xlu0 %390 }
  0xf0   : > { %v381_v34 = vrot.slane %v380_v32, 2  ;;  %v392_v35 = vrot.slane %v391_v33, 4 }
  0xf2   : > { %v393_v36 = vadd.f32 %v392_v35, %v391_v33  ;;  %v382_v37 = vadd.f32 %v381_v34, %v380_v32 }
  0xf4   : > { %v394_v38 = vrot.slane %v393_v36, 2  ;;  %v383_v39 = vrot.slane %v382_v37, 1 }
  0xf6   : > { %v395_v40 = vadd.f32 %v394_v38, %v393_v36  ;;  %v384_v41 = vadd.f32 %v383_v39, %v382_v37 }
  0xf8   : > { %578 = vpush %v384_v41  ;;  %v396_v42 = vrot.slane %v395_v40, 1 }
  0xfa   : > { %v397_v43 = vadd.f32 %v396_v42, %v395_v40 }
  0xfc   : > { %580 = vpush %v397_v43 }
 0x129   : > { %s579_s5 = spop %578 }
 0x12a   : > { %v386_v44 = vstv %s579_s5 }
 0x12b   : > { %388 = vst.msk [vmem:[%s340_s7] sm:$0x1] %vm387_vm1, %v386_v44 }
 0x12d   : > { %s581_s15 = spop %580 }
 0x12e   : > { %v399_v45 = vstv %s581_s15 }
 0x12f   : > { %400 = vst.msk [vmem:[%s346_s14] sm:$0x1] %vm387_vm1, %v399_v45 }
 0x130 PF: > { %s21_s20 = sadd.s32 1, %s758_s20   ;;  %s995_s15 = smov %s742_s16 }
 0x131   : > { %p18_p11 = scmp.ge.s32.totalorder %s21_s20, 4   ;;  %s996_s16 = smov %s746_s17 }
 0x132   : > { %s997_s17 = smov %s838_s27  ;;  %s998_s18 = smov %s754_s19 }
 0x133   : > { %s999_s19 = smov %s1001_s22  ;;  %20 = sbr.rel (!%p18_p11) target bundleno = 6 (0x6), region = 100 }
 0x13a   :  { %442 = vsyncpa [#allocation3], 1 }
 0x13b   :  { %444 = vsyncpa [#allocation3 + $0x1], 1 }
 0x13c   :  { %445 = vsyncpa [#allocation5], 1 }
 0x13d   :  { %447 = vsyncpa [#allocation5 + $0x1], 1 }

</bundles_post_ra>
